<compile_context>
chip_gen: v6e
topology: v6e:2x2x1
jax: 0.10.0
libtpu: 0.0.40
codegen_flags: <defaults>
</compile_context>

<pallas_src>
import functools

import jax
import jax.numpy as jnp
from jax.experimental import pallas as pl
from jax.experimental.pallas import tpu as pltpu


def _round_up(a: int, m: int) -> int:
    return ((a + m - 1) // m) * m


def _layer_norm_kernel(x_ref, gamma_ref, beta_ref, o_ref, *, n_valid: int, eps: float):
    # x_ref: (TB, F_pad) fp32   gamma_ref/beta_ref: (1, F_pad) fp32
    x = x_ref[...]
    f_pad = x.shape[-1]

    if n_valid != f_pad:
        # Padded lanes must not contribute to the statistics.
        lane = jax.lax.broadcasted_iota(jnp.int32, x.shape, dimension=1)
        mask = lane < n_valid
        x_for_sum = jnp.where(mask, x, 0.0)
    else:
        mask = None
        x_for_sum = x

    inv_n = 1.0 / float(n_valid)
    inv_nm1 = 1.0 / float(max(n_valid - 1, 1))  # unbiased (Bessel) estimator

    mean = jnp.sum(x_for_sum, axis=-1, keepdims=True) * inv_n
    centered = x - mean
    if mask is not None:
        centered = jnp.where(mask, centered, 0.0)

    var = jnp.sum(centered * centered, axis=-1, keepdims=True) * inv_nm1
    std = jnp.sqrt(var)
    inv = 1.0 / (std + eps)            # PyTorch: divide by (std + eps)

    y = centered * inv
    o_ref[...] = (y * gamma_ref[...] + beta_ref[...]).astype(o_ref.dtype)


def layer_norm(x, gamma, beta, eps: float = 1e-5, affine: bool = True):
    """LayerNorm forward matching the PyTorch module.

    x:     (B, C, ...) any rank >= 2
    gamma: (C,) scale   (used iff affine)
    beta:  (C,) shift   (used iff affine)
    """
    orig_shape = x.shape
    orig_dtype = x.dtype
    B = x.shape[0]
    C = x.shape[1]
    spatial = 1
    for d in x.shape[2:]:
        spatial *= d
    F = C * spatial

    TB = 8                                   # fp32 sublane granularity per tile
    F_pad = _round_up(F, 128)                # lane-dense features
    B_pad = _round_up(B, TB)                 # sublane-dense batch

    # Flatten like x.view(B, -1); pad to the TPU-friendly slab.
    x2 = x.reshape(B, F).astype(jnp.float32)
    x2 = jnp.pad(x2, ((0, B_pad - B), (0, F_pad - F)))

    # Pre-broadcast per-channel affine params to per-feature rows (hoisted,
    # tiny, done once per call outside the kernel).
    if affine:
        g_flat = jnp.broadcast_to(
            gamma.astype(jnp.float32)[:, None], (C, spatial)).reshape(F)
        b_flat = jnp.broadcast_to(
            beta.astype(jnp.float32)[:, None], (C, spatial)).reshape(F)
    else:
        g_flat = jnp.ones((F,), jnp.float32)
        b_flat = jnp.zeros((F,), jnp.float32)
    g_flat = jnp.pad(g_flat, (0, F_pad - F)).reshape(1, F_pad)
    b_flat = jnp.pad(b_flat, (0, F_pad - F)).reshape(1, F_pad)

    kernel = functools.partial(_layer_norm_kernel, n_valid=F, eps=float(eps))

    out = pl.pallas_call(
        kernel,
        out_shape=jax.ShapeDtypeStruct((B_pad, F_pad), jnp.float32),
        grid_spec=pltpu.PrefetchScalarGridSpec(
            num_scalar_prefetch=0,
            grid=(B_pad // TB,),
            in_specs=[
                pl.BlockSpec((TB, F_pad), lambda i: (i, 0)),
                pl.BlockSpec((1, F_pad), lambda i: (0, 0)),
                pl.BlockSpec((1, F_pad), lambda i: (0, 0)),
            ],
            out_specs=pl.BlockSpec((TB, F_pad), lambda i: (i, 0)),
        ),
        compiler_params=pltpu.CompilerParams(
            # Batch tiles are independent -> v7x's two TensorCores split them.
            dimension_semantics=("parallel",)),
    )(x2, g_flat, b_flat)

    return out[:B, :F].reshape(orig_shape).astype(orig_dtype)


def layer_norm_ref(x, gamma, beta, eps: float = 1e-5, affine: bool = True):
    """Pure-JAX reference with the exact PyTorch semantics (unbiased std)."""
    B = x.shape[0]
    xf = x.reshape(B, -1).astype(jnp.float32)
    n = xf.shape[1]
    mean = jnp.mean(xf, axis=1)
    std = jnp.sqrt(jnp.sum((xf - mean[:, None]) ** 2, axis=1) / (n - 1))
    shape = (-1,) + (1,) * (x.ndim - 1)
    y = (x - mean.reshape(shape)) / (std.reshape(shape) + eps)
    if affine:
        gshape = (1, -1) + (1,) * (x.ndim - 2)
        y = y * gamma.reshape(gshape) + beta.reshape(gshape)
    return y


if __name__ == "__main__":
    key = jax.random.PRNGKey(0)
    k_x, k_g = jax.random.split(key)

    # Small NCHW input consistent with how the module is used.
    B, C, H, W = 2, 4, 16, 16
    x = jax.random.normal(k_x, (B, C, H, W), jnp.float32)
    gamma = jax.random.uniform(k_g, (C,), jnp.float32)   # matches torch .uniform_()
    beta = jnp.zeros((C,), jnp.float32)                  # matches torch.zeros

    ln = jax.jit(layer_norm, static_argnames=("eps", "affine"))
    out = ln(x, gamma, beta)
    out = jax.block_until_ready(out)

    ref = layer_norm_ref(x, gamma, beta)
    assert out.shape == x.shape
    assert jnp.allclose(out, ref, atol=1e-5, rtol=1e-5), float(
        jnp.max(jnp.abs(out - ref)))

    print("KERNEL_OK")
</pallas_src>

<mosaic_0001>
module attributes {stable_mosaic.version = 11 : i64} {
  func.func @_layer_norm_kernel(%arg0: i32, %arg1: memref<8x1024xf32, #tpu.memory_space<vmem>>, %arg2: memref<1x1024xf32, #tpu.memory_space<vmem>>, %arg3: memref<1x1024xf32, #tpu.memory_space<vmem>>, %arg4: memref<8x1024xf32, #tpu.memory_space<vmem>>) attributes {dimension_semantics = [#tpu.dimension_semantics<parallel>], iteration_bounds = array<i64: 1>, scalar_prefetch = 0 : i64, scratch_operands = 0 : i64, tpu.core_type = #tpu.core_type<tc>, window_params = [{transform_indices = @transform_0, window_bounds = array<i64: 8, 1024>}, {pipeline_mode = #tpu.pipeline_mode<synchronous>, transform_indices = @transform_1, window_bounds = array<i64: 1, 1024>}, {pipeline_mode = #tpu.pipeline_mode<synchronous>, transform_indices = @transform_2, window_bounds = array<i64: 1, 1024>}, {transform_indices = @transform_3, window_bounds = array<i64: 8, 1024>}]} {
    %c0 = arith.constant 0 : index
    %c0_0 = arith.constant 0 : index
    %0 = vector.load %arg1[%c0, %c0_0] : memref<8x1024xf32, #tpu.memory_space<vmem>>, vector<8x1024xf32>
    %cst = arith.constant dense<0.000000e+00> : vector<8xf32>
    %1 = vector.multi_reduction <add>, %0, %cst [1] : vector<8x1024xf32> to vector<8xf32>
    %2 = vector.shape_cast %1 : vector<8xf32> to vector<8x1xf32>
    %cst_1 = arith.constant 9.765625E-4 : f32
    %3 = vector.broadcast %cst_1 : f32 to vector<8x1xf32>
    %4 = arith.mulf %2, %3 : vector<8x1xf32>
    %5 = vector.broadcast %4 : vector<8x1xf32> to vector<8x1024xf32>
    %6 = arith.subf %0, %5 : vector<8x1024xf32>
    %7 = arith.mulf %6, %6 : vector<8x1024xf32>
    %cst_2 = arith.constant dense<0.000000e+00> : vector<8xf32>
    %8 = vector.multi_reduction <add>, %7, %cst_2 [1] : vector<8x1024xf32> to vector<8xf32>
    %9 = vector.shape_cast %8 : vector<8xf32> to vector<8x1xf32>
    %cst_3 = arith.constant 9.77517105E-4 : f32
    %10 = vector.broadcast %cst_3 : f32 to vector<8x1xf32>
    %11 = arith.mulf %9, %10 : vector<8x1xf32>
    %12 = math.sqrt %11 : vector<8x1xf32>
    %cst_4 = arith.constant 9.99999974E-6 : f32
    %13 = vector.broadcast %cst_4 : f32 to vector<8x1xf32>
    %14 = arith.addf %12, %13 : vector<8x1xf32>
    %cst_5 = arith.constant 1.000000e+00 : f32
    %15 = vector.broadcast %cst_5 : f32 to vector<8x1xf32>
    %16 = arith.divf %15, %14 : vector<8x1xf32>
    %17 = vector.broadcast %16 : vector<8x1xf32> to vector<8x1024xf32>
    %18 = arith.mulf %6, %17 : vector<8x1024xf32>
    %c0_6 = arith.constant 0 : index
    %c0_7 = arith.constant 0 : index
    %19 = vector.load %arg2[%c0_6, %c0_7] : memref<1x1024xf32, #tpu.memory_space<vmem>>, vector<1x1024xf32>
    %20 = vector.broadcast %19 : vector<1x1024xf32> to vector<8x1024xf32>
    %21 = arith.mulf %18, %20 : vector<8x1024xf32>
    %c0_8 = arith.constant 0 : index
    %c0_9 = arith.constant 0 : index
    %22 = vector.load %arg3[%c0_8, %c0_9] : memref<1x1024xf32, #tpu.memory_space<vmem>>, vector<1x1024xf32>
    %23 = vector.broadcast %22 : vector<1x1024xf32> to vector<8x1024xf32>
    %24 = arith.addf %21, %23 : vector<8x1024xf32>
    %c0_10 = arith.constant 0 : index
    %c0_11 = arith.constant 0 : index
    %25 = vector.load %arg4[%c0_10, %c0_11] : memref<8x1024xf32, #tpu.memory_space<vmem>>, vector<8x1024xf32>
    tpu.vector_store %arg4[%c0_10, %c0_11], %24 {strides = array<i32>} : memref<8x1024xf32, #tpu.memory_space<vmem>>, vector<8x1024xf32>,
    return
  }
  func.func @transform_0(%arg0: i32) -> (i32, i32) {
    %c0_i32 = arith.constant 0 : i32
    %c0_i32_0 = arith.constant 0 : i32
    return %arg0, %c0_i32 : i32, i32
  }
  func.func @transform_1(%arg0: i32) -> (i32, i32) {
    %c0_i32 = arith.constant 0 : i32
    %c0_i32_0 = arith.constant 0 : i32
    %c0_i32_1 = arith.constant 0 : i32
    return %c0_i32, %c0_i32_0 : i32, i32
  }
  func.func @transform_2(%arg0: i32) -> (i32, i32) {
    %c0_i32 = arith.constant 0 : i32
    %c0_i32_0 = arith.constant 0 : i32
    %c0_i32_1 = arith.constant 0 : i32
    return %c0_i32, %c0_i32_0 : i32, i32
  }
  func.func @transform_3(%arg0: i32) -> (i32, i32) {
    %c0_i32 = arith.constant 0 : i32
    %c0_i32_0 = arith.constant 0 : i32
    return %arg0, %c0_i32 : i32, i32
  }
}

</mosaic_0001>

<bundles_post_ra>
// kernel: layer_norm.1
= control target key start
LH: loop header
LB: loop body
LE: loop exit
PB: predicated region body
PF: predicated region fallthrough
CT: control target
= control target key end

     0   :  { %v78_v47 = vlaneseq  ;;  %s296_s0 = inlined_call_operand.vmem [shape: f32[8,1024], index: 0, kind: input, shape index: {}]   ;;  %s297_s1 = inlined_call_operand.vmem [shape: f32[1,1024], index: 1, kind: input, shape index: {}]   ;;  %s298_s2 = inlined_call_operand.vmem [shape: f32[1,1024], index: 2, kind: input, shape index: {}]   ;;  %s299_s3 = inlined_call_operand.vmem [shape: f32[8,1024], index: 3, kind: output, shape index: {}]  }
   0x1   :  { %v14_v0 = vld [vmem:[%s296_s0] sm:$0xff]  ;;  %v15_v1 = vld [vmem:[%s296_s0 + $0x8] sm:$0xff]  ;;  %v16_v2 = vld [vmem:[%s296_s0 + $0x10] sm:$0xff] }
   0x2   :  { %v22_v3 = vadd.f32 %v15_v1, %v14_v0  ;;  %v17_v4 = vld [vmem:[%s296_s0 + $0x18] sm:$0xff]  ;;  %v18_v6 = vld [vmem:[%s296_s0 + $0x20] sm:$0xff]  ;;  %v19_v8 = vld [vmem:[%s296_s0 + $0x28] sm:$0xff]  ;;  %v79_v49 = vshrl.u32 %v78_v47, 7 }
   0x3   :  { %v20_v10 = vld [vmem:[%s296_s0 + $0x30] sm:$0xff]  ;;  %v21_v12 = vld [vmem:[%s296_s0 + $0x38] sm:$0xff]  ;;  %v76_v54 = vld [vmem:[%s297_s1] sm:$0xff] }
   0x4   :  { %v23_v5 = vadd.f32 %v22_v3, %v16_v2  ;;  %v80_v50 = vsub.s32 0, %v79_v49  ;;  %v84_v51 = vsub.s32 1, %v79_v49  ;;  %v88_v52 = vsub.s32 2, %v79_v49  ;;  %v126_v59 = vld [vmem:[%s298_s2] sm:$0xff] }
   0x5   :  { %v92_v53 = vsub.s32 3, %v79_v49  ;;  %v96_v55 = vsub.s32 4, %v79_v49  ;;  %v100_v56 = vsub.s32 5, %v79_v49  ;;  %v104_v57 = vsub.s32 6, %v79_v49 }
   0x6   :  { %v24_v7 = vadd.f32 %v23_v5, %v17_v4  ;;  %v108_v58 = vsub.s32 7, %v79_v49  ;;  %v81_v60 = vrot.slane %v76_v54, %v80_v50  ;;  %v85_v61 = vrot.slane %v76_v54, %v84_v51 }
   0x7   :  { %v89_v62 = vrot.slane %v76_v54, %v88_v52  ;;  %v93_v63 = vrot.slane %v76_v54, %v92_v53  ;;  %v135_v5 = vrot.slane %v126_v59, %v84_v51 }
   0x8   :  { %v25_v9 = vadd.f32 %v24_v7, %v18_v6  ;;  %v109_v3 = vrot.slane %v76_v54, %v108_v58  ;;  %v143_v7 = vrot.slane %v126_v59, %v92_v53 }
   0xa   :  { %v26_v11 = vadd.f32 %v25_v9, %v19_v8  ;;  %v147_v9 = vrot.slane %v126_v59, %v96_v55 }
   0xc   :  { %v27_v13 = vadd.f32 %v26_v11, %v20_v10  ;;  %v155_v11 = vrot.slane %v126_v59, %v104_v57 }
   0xe   :  { %v28_v14 = vadd.f32 %v27_v13, %v21_v12 }
  0x10   :  { %29 = vadd.xlane.f32.xlu0 %v28_v14 }
  0x99   :  { %v30_v15 = vpop.xlane.xlu0 %29 }
  0x9a   :  { %v31_v16 = vmul.f32 0.0009765625, %v30_v15 }
  0x9c   :  { %v236_v17 = vsub.f32 %v14_v0, %v31_v16  ;;  %v238_v18 = vsub.f32 %v15_v1, %v31_v16  ;;  %v240_v19 = vsub.f32 %v16_v2, %v31_v16  ;;  %v242_v20 = vsub.f32 %v17_v4, %v31_v16 }
  0x9d   :  { %v248_v23 = vsub.f32 %v18_v6, %v31_v16  ;;  %v252_v26 = vsub.f32 %v19_v8, %v31_v16  ;;  %v38_v29 = vsub.f32 %v20_v10, %v31_v16  ;;  %v39_v32 = vsub.f32 %v21_v12, %v31_v16 }
  0x9e   :  { %v40_v21 = vmul.f32 %v236_v17, %v236_v17  ;;  %v41_v22 = vmul.f32 %v238_v18, %v238_v18  ;;  %v42_v24 = vmul.f32 %v240_v19, %v240_v19  ;;  %v43_v27 = vmul.f32 %v242_v20, %v242_v20 }
  0x9f   :  { %v44_v30 = vmul.f32 %v248_v23, %v248_v23  ;;  %v45_v33 = vmul.f32 %v252_v26, %v252_v26  ;;  %v46_v35 = vmul.f32 %v38_v29, %v38_v29  ;;  %v47_v37 = vmul.f32 %v39_v32, %v39_v32 }
  0xa0   :  { %v48_v25 = vadd.f32 %v41_v22, %v40_v21  ;;  %v97_v0 = vrot.slane %v76_v54, %v96_v55  ;;  %v101_v1 = vrot.slane %v76_v54, %v100_v56  ;;  %v105_v2 = vrot.slane %v76_v54, %v104_v57 }
  0xa1   :  { %v131_v4 = vrot.slane %v126_v59, %v80_v50  ;;  %v139_v6 = vrot.slane %v126_v59, %v88_v52  ;;  %v151_v10 = vrot.slane %v126_v59, %v100_v56  ;;  %v159_v12 = vrot.slane %v126_v59, %v108_v58 }
  0xa2   :  { %v49_v28 = vadd.f32 %v48_v25, %v42_v24 }
  0xa4   :  { %v50_v31 = vadd.f32 %v49_v28, %v43_v27 }
  0xa6   :  { %v51_v34 = vadd.f32 %v50_v31, %v44_v30 }
  0xa8   :  { %v52_v36 = vadd.f32 %v51_v34, %v45_v33 }
  0xaa   :  { %v53_v38 = vadd.f32 %v52_v36, %v46_v35 }
  0xac   :  { %v54_v39 = vadd.f32 %v53_v38, %v47_v37 }
  0xae   :  { %55 = vadd.xlane.f32.xlu0 %v54_v39 }
 0x137   :  { %v56_v40 = vpop.xlane.xlu0 %55 }
 0x138   :  { %v57_v41 = vmul.f32 0.0009775171, %v56_v40 }
 0x13a   :  { %188 = vrsqrt.f32 %v57_v41  ;;  %vm60_vm0 = vcmp.eq.f32.partialorder %v57_v41, inf  ;;  %v63_v44 = vand.u32 2147483648, %v57_v41  ;;  %vm62_vm1 = vcmp.eq.f32.partialorder %v57_v41, 0.0 }
 0x147   :  { %v189_v42 = vpop.eup %188 }
 0x148   :  { %v59_v43 = vmul.f32 %v189_v42, %v57_v41 }
 0x14a   :  { %v61_v45 = vsel %vm60_vm0, %v57_v41, %v59_v43 }
 0x14b   :  { %v64_v46 = vsel %vm62_vm1, %v63_v44, %v61_v45 }
 0x14c   :  { %v65_v48 = vadd.f32 1e-05, %v64_v46 }
 0x14e   :  { %190 = vrcp.f32 %v65_v48 }
 0x15b   :  { %v191_v8 = vpop.eup %190 }
 0x15c   :  { %v68_v13 = vmul.f32 %v191_v8, %v236_v17  ;;  %v69_v14 = vmul.f32 %v191_v8, %v238_v18  ;;  %v70_v15 = vmul.f32 %v191_v8, %v240_v19  ;;  %v71_v16 = vmul.f32 %v191_v8, %v242_v20 }
 0x15d   :  { %v72_v21 = vmul.f32 %v191_v8, %v248_v23  ;;  %v73_v22 = vmul.f32 %v191_v8, %v252_v26  ;;  %v74_v24 = vmul.f32 %v191_v8, %v38_v29  ;;  %v75_v25 = vmul.f32 %v191_v8, %v39_v32 }
 0x15e   :  { %v118_v27 = vmul.f32 %v81_v60, %v68_v13  ;;  %v119_v28 = vmul.f32 %v85_v61, %v69_v14  ;;  %v120_v30 = vmul.f32 %v89_v62, %v70_v15  ;;  %v121_v31 = vmul.f32 %v93_v63, %v71_v16 }
 0x15f   :  { %v122_v33 = vmul.f32 %v97_v0, %v72_v21  ;;  %v123_v34 = vmul.f32 %v101_v1, %v73_v22  ;;  %v124_v35 = vmul.f32 %v105_v2, %v74_v24  ;;  %v125_v17 = vmul.f32 %v109_v3, %v75_v25 }
 0x160   :  { %v168_v36 = vadd.f32 %v131_v4, %v118_v27  ;;  %v169_v18 = vadd.f32 %v135_v5, %v119_v28  ;;  %v170_v37 = vadd.f32 %v139_v6, %v120_v30  ;;  %v171_v19 = vadd.f32 %v143_v7, %v121_v31 }
 0x161   :  { %v172_v38 = vadd.f32 %v147_v9, %v122_v33  ;;  %v173_v20 = vadd.f32 %v151_v10, %v123_v34  ;;  %v174_v39 = vadd.f32 %v155_v11, %v124_v35  ;;  %v175_v23 = vadd.f32 %v159_v12, %v125_v17 }
 0x162   :  { %176 = vst [vmem:[%s299_s3] sm:$0xff] %v168_v36  ;;  %177 = vst [vmem:[%s299_s3 + $0x8] sm:$0xff] %v169_v18 }
 0x163   :  { %178 = vst [vmem:[%s299_s3 + $0x10] sm:$0xff] %v170_v37  ;;  %179 = vst [vmem:[%s299_s3 + $0x18] sm:$0xff] %v171_v19 }
 0x164   :  { %180 = vst [vmem:[%s299_s3 + $0x20] sm:$0xff] %v172_v38  ;;  %181 = vst [vmem:[%s299_s3 + $0x28] sm:$0xff] %v173_v20 }
 0x165   :  { %182 = vst [vmem:[%s299_s3 + $0x30] sm:$0xff] %v174_v39  ;;  %183 = vst [vmem:[%s299_s3 + $0x38] sm:$0xff] %v175_v23 }

</bundles_post_ra>
